<compile_context>
chip_gen: v7x
topology: tpu7x:2x2x1
jax: 0.10.0
libtpu: 0.0.40
codegen_flags: <defaults>
</compile_context>

<pallas_src>
from itertools import chain
from math import sqrt

import jax
import jax.numpy as jnp
from jax.experimental import pallas as pl
from jax.experimental.pallas import tpu as pltpu


def default_hooker(userTrans, userFeature, itemFeature, itemTrans,
                   contextFeature, contextTrans):
    return list(chain(userTrans, itemTrans, contextTrans))


def _pruning_kernel(fm_ref, pg_ref, vt_ref, x_ref, o_ref):
    """Fused feature gating + value transform + gated field interactions.

    fm_ref: (F, 1, D)  per-field multiplier = L0 gate * 1/(||field||_2 * sqrt(F))
    pg_ref: (F, 1, F)  pairwise interaction gates, pg_ref[f, 0, g] = z[f, g]
    vt_ref: (D, D)     valueTransform
    x_ref : (F, TB, D) field-major batch tile of raw features
    o_ref : (F, TB, D) out[f, b, :] = sum_g z[f,g] * <xp[f,b,:], xp[g,b,:]> * (xp[g,b,:] @ VT)
    """
    x = x_ref[...].astype(jnp.float32)                 # (F, TB, D)
    fm = fm_ref[...].astype(jnp.float32)               # (F, 1, D)
    xp = x * fm                                        # normalized + feature-pruned

    vt = vt_ref[...].astype(jnp.float32)               # (D, D)
    pg = pg_ref[...].astype(jnp.float32)               # (F, 1, F)

    n_field, tb, d = x_ref.shape
    acc = jnp.zeros((n_field, tb, d), jnp.float32)
    # Static unroll over the (small) field axis; every op below is vectorized
    # over the whole (TB, D) batch tile — no per-batch-element work.
    for g in range(n_field):
        xg = xp[g]                                                       # (TB, D)
        # value rows for field g: one dense MXU matmul over the batch tile
        vg = jnp.dot(xg, vt, preferred_element_type=jnp.float32)        # (TB, D)
        # interaction scores, column g: <xp[f,b,:], xp[g,b,:]>
        s_g = jnp.sum(xp * xg[None, :, :], axis=-1, keepdims=True)      # (F, TB, 1)
        w_g = s_g * pg[:, :, g:g + 1]                                    # gated scores
        acc = acc + w_g * vg[None, :, :]                                 # (F, TB, D)
    o_ref[...] = acc.astype(o_ref.dtype)


def _field_aware_pruning_call(x_fbd, feat_mul, pair_gate, value_transform,
                              *, batch_tile=256):
    """x_fbd: (F, B, D) field-major features. Returns (F, B, D)."""
    n_field, batch, dim = x_fbd.shape
    if batch <= batch_tile:
        tb, b_pad = batch, batch
    else:
        tb = batch_tile                                   # multiple of 8 by construction
        b_pad = ((batch + tb - 1) // tb) * tb
        if b_pad != batch:                                # zero rows -> zero (masked) outputs
            x_fbd = jnp.pad(x_fbd, ((0, 0), (0, b_pad - batch), (0, 0)))
    grid = (b_pad // tb,)

    out = pl.pallas_call(
        _pruning_kernel,
        out_shape=jax.ShapeDtypeStruct((n_field, b_pad, dim), x_fbd.dtype),
        grid=grid,
        in_specs=[
            pl.BlockSpec((n_field, 1, dim), lambda i: (0, 0, 0)),      # resident multiplier
            pl.BlockSpec((n_field, 1, n_field), lambda i: (0, 0, 0)),  # resident pair gates
            pl.BlockSpec((dim, dim), lambda i: (0, 0)),                # resident valueTransform
            pl.BlockSpec((n_field, tb, dim), lambda i: (0, i, 0)),     # batch tile
        ],
        out_specs=pl.BlockSpec((n_field, tb, dim), lambda i: (0, i, 0)),
        compiler_params=pltpu.CompilerParams(
            dimension_semantics=("parallel",)),
    )(feat_mul, pair_gate, value_transform, x_fbd)
    return out[:, :batch, :] if b_pad != batch else out


def _hard_concrete_gate(log_alpha, beta, zeta, gamma):
    """Deterministic (eval-mode) hard-concrete gate and expected L0."""
    z = jnp.clip(jax.nn.sigmoid(log_alpha) * (zeta - gamma) + gamma, 0.0, 1.0)
    l0 = jnp.sum(jax.nn.sigmoid(log_alpha - beta * jnp.log(-gamma / zeta)))
    return z, l0


class FieldAwarePruningV2:
    """JAX/Pallas port of Models/Modules/FusionModule.FieldAwarePruningV2 (eval forward)."""

    def __init__(self, featureNumb, featureDim, fieldDim, beta, zeta, gamma,
                 key, hooker=None, dtype=jnp.float32, batch_tile=256):
        self.gamma = gamma
        self.zeta = zeta
        self.beta = beta
        self.FieldDim = fieldDim
        self.FeatureDim = featureDim
        self.featureNumb = featureNumb
        self.hooker = default_hooker if hooker is None else hooker
        self.batch_tile = batch_tile
        self.dtype = dtype

        k_field, k_vt, k_fp, k_ip = jax.random.split(key, 4)
        self.field = (jax.random.normal(k_field, (featureNumb, fieldDim)) * 0.001).astype(dtype)
        self.valueTransform = (jax.random.normal(k_vt, (featureDim, featureDim)) * 0.001).astype(dtype)
        # TODO(synk): parameters backing the hard-concrete stand-ins for the unprovided
        # FeaturePruningLayer / InteractionPruning submodules.
        self.fp_weight = (jax.random.normal(k_fp, (fieldDim,)) * 0.001).astype(dtype)
        self.fp_bias = jnp.zeros((), dtype)
        self.ip_log_alpha = (jax.random.normal(k_ip, (featureNumb, featureNumb)) * 0.001).astype(dtype)

        self.featureL0 = None
        self.interactionL0 = None
        self.structureL0 = None
        self.output = None

    def _gates(self):
        feat_logit = self.field @ self.fp_weight + self.fp_bias                 # (F,)
        z_feat, feat_l0 = _hard_concrete_gate(feat_logit, self.beta[0],
                                              self.zeta[0], self.gamma[0])
        z_pair, pair_l0 = _hard_concrete_gate(self.ip_log_alpha, self.beta[1],
                                              self.zeta[1], self.gamma[1])
        return z_feat, z_pair, feat_l0, pair_l0

    def __call__(self, userTrans, userFeature, itemFeature, itemTrans,
                 contextFeature, contextTrans):
        feature = self.hooker(userTrans, userFeature, itemFeature, itemTrans,
                              contextFeature, contextTrans)
        # Field-major stack (F, B, D); transposed back to (B, F, D) at the end.
        x = jnp.stack(feature, axis=0).astype(self.dtype)
        n_field, batch, dim = x.shape
        assert n_field == self.featureNumb and dim == self.FeatureDim

        # torch: norm = ||feature_i||_2 * sqrt(featureNumb); divide only if nonzero
        norms = jnp.sqrt(jnp.sum(jnp.square(x), axis=(1, 2))) * sqrt(self.featureNumb)
        inv_norm = jnp.where(norms > 0, 1.0 / norms, 1.0)                       # (F,)

        z_feat, z_pair, feat_l0, pair_l0 = self._gates()
        self.featureL0 = feat_l0
        self.interactionL0 = pair_l0

        feat_mul = jnp.broadcast_to(
            (z_feat * inv_norm)[:, None, None].astype(self.dtype), (n_field, 1, dim))
        pair_gate = z_pair[:, None, :].astype(self.dtype)                       # (F, 1, F)

        out_fbd = _field_aware_pruning_call(x, feat_mul, pair_gate,
                                            self.valueTransform,
                                            batch_tile=self.batch_tile)
        self.output = jnp.transpose(out_fbd, (1, 0, 2))                         # (B, F, D)
        return self.output

    def reference_forward(self, userTrans, userFeature, itemFeature, itemTrans,
                          contextFeature, contextTrans):
        """Pure-JAX (no Pallas) reference of the same forward, for verification."""
        feature = self.hooker(userTrans, userFeature, itemFeature, itemTrans,
                              contextFeature, contextTrans)
        cat = jnp.stack(feature, axis=1).astype(jnp.float32)                    # (B, F, D)
        norms = jnp.sqrt(jnp.sum(jnp.square(cat), axis=(0, 2))) * sqrt(self.featureNumb)
        cat = cat / jnp.where(norms > 0, norms, 1.0)[None, :, None]
        z_feat, z_pair, _, _ = self._gates()
        fp = cat * z_feat[None, :, None]
        weight = jnp.einsum("bfd,bgd->bfg", fp, fp) * z_pair[None, :, :]
        value = jnp.einsum("bfd,de->bfe", fp, self.valueTransform.astype(jnp.float32))
        return jnp.einsum("bfg,bgd->bfd", weight, value)


if __name__ == "__main__":
    key = jax.random.PRNGKey(0)

    B = 4              # batch
    D = 32             # featureDim (per-field embedding dim)
    field_dim = 8      # fieldDim
    n_user, n_item, n_ctx = 2, 2, 2
    F = n_user + n_item + n_ctx                    # featureNumb (fields)
    beta = [2.0 / 3.0, 2.0 / 3.0]
    zeta = [1.1, 1.1]
    gamma = [-0.1, -0.1]

    key, *fkeys = jax.random.split(key, 1 + F)
    feats = [jax.random.normal(k, (B, D), dtype=jnp.float32) for k in fkeys]
    userTrans = feats[:n_user]
    itemTrans = feats[n_user:n_user + n_item]
    contextTrans = feats[n_user + n_item:]
    userFeature, itemFeature, contextFeature = [], [], []   # unused by defaultHooker

    key, mkey = jax.random.split(key)
    model = FieldAwarePruningV2(F, D, field_dim, beta, zeta, gamma, key=mkey)

    out = model(userTrans, userFeature, itemFeature, itemTrans,
                contextFeature, contextTrans)
    out = jax.block_until_ready(out)

    assert out.shape == (B, F, D), (out.shape, (B, F, D))
    assert bool(jnp.all(jnp.isfinite(out)))

    ref = model.reference_forward(userTrans, userFeature, itemFeature, itemTrans,
                                  contextFeature, contextTrans)
    rel_err = float(jnp.max(jnp.abs(out - ref)) / (jnp.max(jnp.abs(ref)) + 1e-12))
    assert rel_err < 1e-3, f"mismatch vs pure-JAX reference: rel_err={rel_err}"

    print("KERNEL_OK")
</pallas_src>

<mosaic_0001>
module attributes {stable_mosaic.version = 11 : i64} {
  func.func @_pruning_kernel(%arg0: i32, %arg1: memref<6x1x32xf32, #tpu.memory_space<vmem>>, %arg2: memref<6x1x6xf32, #tpu.memory_space<vmem>>, %arg3: memref<32x32xf32, #tpu.memory_space<vmem>>, %arg4: memref<6x4x32xf32, #tpu.memory_space<vmem>>, %arg5: memref<6x4x32xf32, #tpu.memory_space<vmem>>) attributes {dimension_semantics = [#tpu.dimension_semantics<parallel>], iteration_bounds = array<i64: 1>, scalar_prefetch = 0 : i64, scratch_operands = 0 : i64, tpu.core_type = #tpu.core_type<tc>, window_params = [{pipeline_mode = #tpu.pipeline_mode<synchronous>, transform_indices = @transform_0, window_bounds = array<i64: 6, 1, 32>}, {pipeline_mode = #tpu.pipeline_mode<synchronous>, transform_indices = @transform_1, window_bounds = array<i64: 6, 1, 6>}, {pipeline_mode = #tpu.pipeline_mode<synchronous>, transform_indices = @transform_2, window_bounds = array<i64: 32, 32>}, {transform_indices = @transform_3, window_bounds = array<i64: 6, 4, 32>}, {transform_indices = @transform_4, window_bounds = array<i64: 6, 4, 32>}]} {
    %c0 = arith.constant 0 : index
    %c0_0 = arith.constant 0 : index
    %c0_1 = arith.constant 0 : index
    %0 = vector.load %arg4[%c0, %c0_0, %c0_1] : memref<6x4x32xf32, #tpu.memory_space<vmem>>, vector<6x4x32xf32>
    %c0_2 = arith.constant 0 : index
    %c0_3 = arith.constant 0 : index
    %c0_4 = arith.constant 0 : index
    %1 = vector.load %arg1[%c0_2, %c0_3, %c0_4] : memref<6x1x32xf32, #tpu.memory_space<vmem>>, vector<6x1x32xf32>
    %2 = vector.broadcast %1 : vector<6x1x32xf32> to vector<6x4x32xf32>
    %3 = arith.mulf %0, %2 : vector<6x4x32xf32>
    %c0_5 = arith.constant 0 : index
    %c0_6 = arith.constant 0 : index
    %4 = vector.load %arg3[%c0_5, %c0_6] : memref<32x32xf32, #tpu.memory_space<vmem>>, vector<32x32xf32>
    %c0_7 = arith.constant 0 : index
    %c0_8 = arith.constant 0 : index
    %c0_9 = arith.constant 0 : index
    %5 = vector.load %arg2[%c0_7, %c0_8, %c0_9] : memref<6x1x6xf32, #tpu.memory_space<vmem>>, vector<6x1x6xf32>
    %cst = arith.constant 0.000000e+00 : f32
    %6 = vector.broadcast %cst : f32 to vector<6x4x32xf32>
    %7 = vector.extract_strided_slice %3 {offsets = [0, 0, 0], sizes = [1, 4, 32], strides = [1, 1, 1]} : vector<6x4x32xf32> to vector<1x4x32xf32>
    %8 = vector.shape_cast %7 : vector<1x4x32xf32> to vector<4x32xf32>
    %cst_10 = arith.constant dense<0.000000e+00> : vector<4x32xf32>
    %9 = tpu.matmul %8, %4, %cst_10 {dimension_numbers = #tpu.dot_dimension_numbers<[1], [0], [0], [1], [0, 0, 1, 1], [], []>} : vector<4x32xf32>, vector<32x32xf32>, vector<4x32xf32> -> vector<4x32xf32>
    %10 = vector.shape_cast %8 : vector<4x32xf32> to vector<1x4x32xf32>
    %11 = vector.broadcast %10 : vector<1x4x32xf32> to vector<6x4x32xf32>
    %12 = arith.mulf %3, %11 : vector<6x4x32xf32>
    %cst_11 = arith.constant dense<0.000000e+00> : vector<6x4xf32>
    %13 = vector.multi_reduction <add>, %12, %cst_11 [2] : vector<6x4x32xf32> to vector<6x4xf32>
    %14 = vector.shape_cast %13 : vector<6x4xf32> to vector<6x4x1xf32>
    %15 = vector.extract_strided_slice %5 {offsets = [0, 0, 0], sizes = [6, 1, 1], strides = [1, 1, 1]} : vector<6x1x6xf32> to vector<6x1x1xf32>
    %16 = vector.broadcast %15 : vector<6x1x1xf32> to vector<6x4x1xf32>
    %17 = arith.mulf %14, %16 : vector<6x4x1xf32>
    %18 = vector.shape_cast %9 : vector<4x32xf32> to vector<1x4x32xf32>
    %19 = vector.broadcast %17 : vector<6x4x1xf32> to vector<6x4x32xf32>
    %20 = vector.broadcast %18 : vector<1x4x32xf32> to vector<6x4x32xf32>
    %21 = arith.mulf %19, %20 : vector<6x4x32xf32>
    %22 = arith.addf %6, %21 : vector<6x4x32xf32>
    %23 = vector.extract_strided_slice %3 {offsets = [1, 0, 0], sizes = [1, 4, 32], strides = [1, 1, 1]} : vector<6x4x32xf32> to vector<1x4x32xf32>
    %24 = vector.shape_cast %23 : vector<1x4x32xf32> to vector<4x32xf32>
    %cst_12 = arith.constant dense<0.000000e+00> : vector<4x32xf32>
    %25 = tpu.matmul %24, %4, %cst_12 {dimension_numbers = #tpu.dot_dimension_numbers<[1], [0], [0], [1], [0, 0, 1, 1], [], []>} : vector<4x32xf32>, vector<32x32xf32>, vector<4x32xf32> -> vector<4x32xf32>
    %26 = vector.shape_cast %24 : vector<4x32xf32> to vector<1x4x32xf32>
    %27 = vector.broadcast %26 : vector<1x4x32xf32> to vector<6x4x32xf32>
    %28 = arith.mulf %3, %27 : vector<6x4x32xf32>
    %cst_13 = arith.constant dense<0.000000e+00> : vector<6x4xf32>
    %29 = vector.multi_reduction <add>, %28, %cst_13 [2] : vector<6x4x32xf32> to vector<6x4xf32>
    %30 = vector.shape_cast %29 : vector<6x4xf32> to vector<6x4x1xf32>
    %31 = vector.extract_strided_slice %5 {offsets = [0, 0, 1], sizes = [6, 1, 1], strides = [1, 1, 1]} : vector<6x1x6xf32> to vector<6x1x1xf32>
    %32 = vector.broadcast %31 : vector<6x1x1xf32> to vector<6x4x1xf32>
    %33 = arith.mulf %30, %32 : vector<6x4x1xf32>
    %34 = vector.shape_cast %25 : vector<4x32xf32> to vector<1x4x32xf32>
    %35 = vector.broadcast %33 : vector<6x4x1xf32> to vector<6x4x32xf32>
    %36 = vector.broadcast %34 : vector<1x4x32xf32> to vector<6x4x32xf32>
    %37 = arith.mulf %35, %36 : vector<6x4x32xf32>
    %38 = arith.addf %22, %37 : vector<6x4x32xf32>
    %39 = vector.extract_strided_slice %3 {offsets = [2, 0, 0], sizes = [1, 4, 32], strides = [1, 1, 1]} : vector<6x4x32xf32> to vector<1x4x32xf32>
    %40 = vector.shape_cast %39 : vector<1x4x32xf32> to vector<4x32xf32>
    %cst_14 = arith.constant dense<0.000000e+00> : vector<4x32xf32>
    %41 = tpu.matmul %40, %4, %cst_14 {dimension_numbers = #tpu.dot_dimension_numbers<[1], [0], [0], [1], [0, 0, 1, 1], [], []>} : vector<4x32xf32>, vector<32x32xf32>, vector<4x32xf32> -> vector<4x32xf32>
    %42 = vector.shape_cast %40 : vector<4x32xf32> to vector<1x4x32xf32>
    %43 = vector.broadcast %42 : vector<1x4x32xf32> to vector<6x4x32xf32>
    %44 = arith.mulf %3, %43 : vector<6x4x32xf32>
    %cst_15 = arith.constant dense<0.000000e+00> : vector<6x4xf32>
    %45 = vector.multi_reduction <add>, %44, %cst_15 [2] : vector<6x4x32xf32> to vector<6x4xf32>
    %46 = vector.shape_cast %45 : vector<6x4xf32> to vector<6x4x1xf32>
    %47 = vector.extract_strided_slice %5 {offsets = [0, 0, 2], sizes = [6, 1, 1], strides = [1, 1, 1]} : vector<6x1x6xf32> to vector<6x1x1xf32>
    %48 = vector.broadcast %47 : vector<6x1x1xf32> to vector<6x4x1xf32>
    %49 = arith.mulf %46, %48 : vector<6x4x1xf32>
    %50 = vector.shape_cast %41 : vector<4x32xf32> to vector<1x4x32xf32>
    %51 = vector.broadcast %49 : vector<6x4x1xf32> to vector<6x4x32xf32>
    %52 = vector.broadcast %50 : vector<1x4x32xf32> to vector<6x4x32xf32>
    %53 = arith.mulf %51, %52 : vector<6x4x32xf32>
    %54 = arith.addf %38, %53 : vector<6x4x32xf32>
    %55 = vector.extract_strided_slice %3 {offsets = [3, 0, 0], sizes = [1, 4, 32], strides = [1, 1, 1]} : vector<6x4x32xf32> to vector<1x4x32xf32>
    %56 = vector.shape_cast %55 : vector<1x4x32xf32> to vector<4x32xf32>
    %cst_16 = arith.constant dense<0.000000e+00> : vector<4x32xf32>
    %57 = tpu.matmul %56, %4, %cst_16 {dimension_numbers = #tpu.dot_dimension_numbers<[1], [0], [0], [1], [0, 0, 1, 1], [], []>} : vector<4x32xf32>, vector<32x32xf32>, vector<4x32xf32> -> vector<4x32xf32>
    %58 = vector.shape_cast %56 : vector<4x32xf32> to vector<1x4x32xf32>
    %59 = vector.broadcast %58 : vector<1x4x32xf32> to vector<6x4x32xf32>
    %60 = arith.mulf %3, %59 : vector<6x4x32xf32>
    %cst_17 = arith.constant dense<0.000000e+00> : vector<6x4xf32>
    %61 = vector.multi_reduction <add>, %60, %cst_17 [2] : vector<6x4x32xf32> to vector<6x4xf32>
    %62 = vector.shape_cast %61 : vector<6x4xf32> to vector<6x4x1xf32>
    %63 = vector.extract_strided_slice %5 {offsets = [0, 0, 3], sizes = [6, 1, 1], strides = [1, 1, 1]} : vector<6x1x6xf32> to vector<6x1x1xf32>
    %64 = vector.broadcast %63 : vector<6x1x1xf32> to vector<6x4x1xf32>
    %65 = arith.mulf %62, %64 : vector<6x4x1xf32>
    %66 = vector.shape_cast %57 : vector<4x32xf32> to vector<1x4x32xf32>
    %67 = vector.broadcast %65 : vector<6x4x1xf32> to vector<6x4x32xf32>
    %68 = vector.broadcast %66 : vector<1x4x32xf32> to vector<6x4x32xf32>
    %69 = arith.mulf %67, %68 : vector<6x4x32xf32>
    %70 = arith.addf %54, %69 : vector<6x4x32xf32>
    %71 = vector.extract_strided_slice %3 {offsets = [4, 0, 0], sizes = [1, 4, 32], strides = [1, 1, 1]} : vector<6x4x32xf32> to vector<1x4x32xf32>
    %72 = vector.shape_cast %71 : vector<1x4x32xf32> to vector<4x32xf32>
    %cst_18 = arith.constant dense<0.000000e+00> : vector<4x32xf32>
    %73 = tpu.matmul %72, %4, %cst_18 {dimension_numbers = #tpu.dot_dimension_numbers<[1], [0], [0], [1], [0, 0, 1, 1], [], []>} : vector<4x32xf32>, vector<32x32xf32>, vector<4x32xf32> -> vector<4x32xf32>
    %74 = vector.shape_cast %72 : vector<4x32xf32> to vector<1x4x32xf32>
    %75 = vector.broadcast %74 : vector<1x4x32xf32> to vector<6x4x32xf32>
    %76 = arith.mulf %3, %75 : vector<6x4x32xf32>
    %cst_19 = arith.constant dense<0.000000e+00> : vector<6x4xf32>
    %77 = vector.multi_reduction <add>, %76, %cst_19 [2] : vector<6x4x32xf32> to vector<6x4xf32>
    %78 = vector.shape_cast %77 : vector<6x4xf32> to vector<6x4x1xf32>
    %79 = vector.extract_strided_slice %5 {offsets = [0, 0, 4], sizes = [6, 1, 1], strides = [1, 1, 1]} : vector<6x1x6xf32> to vector<6x1x1xf32>
    %80 = vector.broadcast %79 : vector<6x1x1xf32> to vector<6x4x1xf32>
    %81 = arith.mulf %78, %80 : vector<6x4x1xf32>
    %82 = vector.shape_cast %73 : vector<4x32xf32> to vector<1x4x32xf32>
    %83 = vector.broadcast %81 : vector<6x4x1xf32> to vector<6x4x32xf32>
    %84 = vector.broadcast %82 : vector<1x4x32xf32> to vector<6x4x32xf32>
    %85 = arith.mulf %83, %84 : vector<6x4x32xf32>
    %86 = arith.addf %70, %85 : vector<6x4x32xf32>
    %87 = vector.extract_strided_slice %3 {offsets = [5, 0, 0], sizes = [1, 4, 32], strides = [1, 1, 1]} : vector<6x4x32xf32> to vector<1x4x32xf32>
    %88 = vector.shape_cast %87 : vector<1x4x32xf32> to vector<4x32xf32>
    %cst_20 = arith.constant dense<0.000000e+00> : vector<4x32xf32>
    %89 = tpu.matmul %88, %4, %cst_20 {dimension_numbers = #tpu.dot_dimension_numbers<[1], [0], [0], [1], [0, 0, 1, 1], [], []>} : vector<4x32xf32>, vector<32x32xf32>, vector<4x32xf32> -> vector<4x32xf32>
    %90 = vector.shape_cast %88 : vector<4x32xf32> to vector<1x4x32xf32>
    %91 = vector.broadcast %90 : vector<1x4x32xf32> to vector<6x4x32xf32>
    %92 = arith.mulf %3, %91 : vector<6x4x32xf32>
    %cst_21 = arith.constant dense<0.000000e+00> : vector<6x4xf32>
    %93 = vector.multi_reduction <add>, %92, %cst_21 [2] : vector<6x4x32xf32> to vector<6x4xf32>
    %94 = vector.shape_cast %93 : vector<6x4xf32> to vector<6x4x1xf32>
    %95 = vector.extract_strided_slice %5 {offsets = [0, 0, 5], sizes = [6, 1, 1], strides = [1, 1, 1]} : vector<6x1x6xf32> to vector<6x1x1xf32>
    %96 = vector.broadcast %95 : vector<6x1x1xf32> to vector<6x4x1xf32>
    %97 = arith.mulf %94, %96 : vector<6x4x1xf32>
    %98 = vector.shape_cast %89 : vector<4x32xf32> to vector<1x4x32xf32>
    %99 = vector.broadcast %97 : vector<6x4x1xf32> to vector<6x4x32xf32>
    %100 = vector.broadcast %98 : vector<1x4x32xf32> to vector<6x4x32xf32>
    %101 = arith.mulf %99, %100 : vector<6x4x32xf32>
    %102 = arith.addf %86, %101 : vector<6x4x32xf32>
    %c0_22 = arith.constant 0 : index
    %c0_23 = arith.constant 0 : index
    %c0_24 = arith.constant 0 : index
    %103 = vector.load %arg5[%c0_22, %c0_23, %c0_24] : memref<6x4x32xf32, #tpu.memory_space<vmem>>, vector<6x4x32xf32>
    tpu.vector_store %arg5[%c0_22, %c0_23, %c0_24], %102 {strides = array<i32>} : memref<6x4x32xf32, #tpu.memory_space<vmem>>, vector<6x4x32xf32>,
    return
  }
  func.func @transform_0(%arg0: i32) -> (i32, i32, i32) {
    %c0_i32 = arith.constant 0 : i32
    %c0_i32_0 = arith.constant 0 : i32
    %c0_i32_1 = arith.constant 0 : i32
    %c0_i32_2 = arith.constant 0 : i32
    return %c0_i32, %c0_i32_0, %c0_i32_1 : i32, i32, i32
  }
  func.func @transform_1(%arg0: i32) -> (i32, i32, i32) {
    %c0_i32 = arith.constant 0 : i32
    %c0_i32_0 = arith.constant 0 : i32
    %c0_i32_1 = arith.constant 0 : i32
    %c0_i32_2 = arith.constant 0 : i32
    return %c0_i32, %c0_i32_0, %c0_i32_1 : i32, i32, i32
  }
  func.func @transform_2(%arg0: i32) -> (i32, i32) {
    %c0_i32 = arith.constant 0 : i32
    %c0_i32_0 = arith.constant 0 : i32
    %c0_i32_1 = arith.constant 0 : i32
    return %c0_i32, %c0_i32_0 : i32, i32
  }
  func.func @transform_3(%arg0: i32) -> (i32, i32, i32) {
    %c0_i32 = arith.constant 0 : i32
    %c0_i32_0 = arith.constant 0 : i32
    %c0_i32_1 = arith.constant 0 : i32
    return %c0_i32, %arg0, %c0_i32_0 : i32, i32, i32
  }
  func.func @transform_4(%arg0: i32) -> (i32, i32, i32) {
    %c0_i32 = arith.constant 0 : i32
    %c0_i32_0 = arith.constant 0 : i32
    %c0_i32_1 = arith.constant 0 : i32
    return %c0_i32, %arg0, %c0_i32_0 : i32, i32, i32
  }
}

</mosaic_0001>

<bundles_post_ra>
// kernel: tpu_custom_call.1
= control target key start
LH: loop header
LB: loop body
LE: loop exit
PB: predicated region body
PF: predicated region fallthrough
CT: control target
= control target key end

     0   :  { %9 = vsyncpa [#allocation3], 0  ;;  %s1611_s0 = inlined_call_operand.hbm [shape: f32[6,1,32], index: 0, kind: input, shape index: {}]   ;;  %s1612_s1 = inlined_call_operand.hbm [shape: f32[6,1,6], index: 1, kind: input, shape index: {}]   ;;  %s1613_s2 = inlined_call_operand.hbm [shape: f32[32,32], index: 2, kind: input, shape index: {}]   ;;  %s1614_s3 = inlined_call_operand.hbm [shape: f32[6,4,32], index: 3, kind: input, shape index: {}]   ;;  %s1615_s4 = inlined_call_operand.hbm [shape: f32[6,4,32], index: 4, kind: output, shape index: {}]  }
   0x1   :  { %10 = vsyncpa [#allocation6], 0 }
   0x2   :  { %11 = vsyncpa [#allocation9], 0 }
   0x3   :  { %12 = vsyncpa [#allocation4], 0  ;;  %s1309_s15 = smov [#allocation5]   ;;  %s1310_s17 = smov [#allocation2]  }
   0x4   :  { %s30_s16 = sshll.u32 %s1309_s15, 4  ;;  %s18_s18 = sshll.u32 %s1310_s17, 4  ;;  %s31_s16 = int_to_ptr.vmem [resolvable:$true] %s30_s16  ;;  %s1354_s18 = int_to_ptr.vmem [resolvable:$true] %s18_s18 }
   0x5   :  { %s1191_s21 = scalar_lea.hbm %s1612_s1, 96 }
   0x6   :  { %p1192_p0 = scmp.ne.s32.totalorder %s1612_s1, %s1191_s21  ;;  %p1195_p1 = scmp.lt.u32.totalorder %s1191_s21, %s1612_s1 }
   0x8   :  { %p1197_p2 = pnand %p1195_p1, %p1192_p0 }
   0xa   :  { %1200 = shalt.err (!%p1197_p2)
}
   0xb   :  { %s1201_s26 = scalar_lea.vmem %s31_s16, 96  ;;  %p1206_p4 = scmp.lt.s32.totalorder %s31_s16, %s31_s16 }
   0xc   :  { %p1202_p3 = scmp.ne.s32.totalorder %s31_s16, %s1201_s26  ;;  %p1207_p5 = scmp.lt.s32.totalorder %s1201_s26, %s1201_s26 }
   0xe   :  { %p1208_p6 = por %p1207_p5, %p1206_p4 }
  0x10   :  { %p1209_p7 = pnand %p1208_p6, %p1202_p3 }
  0x12   :  { %1212 = shalt.err (!%p1209_p7)
}
  0x13   :  { %s1311_s27 = smov 16   ;;  %s1312_s28 = smov 1  }
  0x14   :  { %36 = dma.hbm_to_vmem [thread:$0]  %s1612_s1, 96, %s31_s16, [#allocation6], %s1311_s27, %s1311_s27, %s1312_s28  }
  0x15   :  { %s1213_s7 = scalar_lea.hbm %s1611_s0, 96 }
  0x16   :  { %p1214_p8 = scmp.ne.s32.totalorder %s1611_s0, %s1213_s7  ;;  %p1217_p9 = scmp.lt.u32.totalorder %s1213_s7, %s1611_s0 }
  0x18   :  { %p1219_p10 = pnand %p1217_p9, %p1214_p8 }
  0x1a   :  { %1222 = shalt.err (!%p1219_p10)
}
  0x1b   :  { %s1223_s12 = scalar_lea.vmem %s1354_s18, 96  ;;  %p1228_p12 = scmp.lt.s32.totalorder %s1354_s18, %s1354_s18 }
  0x1c   :  { %p1224_p11 = scmp.ne.s32.totalorder %s1354_s18, %s1223_s12  ;;  %p1229_p13 = scmp.lt.s32.totalorder %s1223_s12, %s1223_s12 }
  0x1e   :  { %p1230_p0 = por %p1229_p13, %p1228_p12 }
  0x20   :  { %p1231_p1 = pnand %p1230_p0, %p1224_p11 }
  0x22   :  { %1234 = shalt.err (!%p1231_p1)
}
  0x23   :  { %24 = dma.hbm_to_vmem [thread:$0]  %s1611_s0, 96, %s1354_s18, [#allocation3], %s1311_s27, %s1311_s27, %s1312_s28  }
  0x24   :  { %s1313_s14 = smov [#allocation7]   ;;  %s1235_s19 = scalar_lea.hbm %s1613_s2, 512 }
  0x25   :  { %s42_s15 = sshll.u32 %s1313_s14, 4  ;;  %p1236_p2 = scmp.ne.s32.totalorder %s1613_s2, %s1235_s19  ;;  %s43_s15 = int_to_ptr.vmem [resolvable:$true] %s42_s15 }
  0x26   :  { %p1239_p3 = scmp.lt.u32.totalorder %s1235_s19, %s1613_s2 }
  0x28   :  { %p1241_p4 = pnand %p1239_p3, %p1236_p2 }
  0x2a   :  { %1244 = shalt.err (!%p1241_p4)
}
  0x2b   :  { %s1245_s24 = scalar_lea.vmem %s43_s15, 512  ;;  %p1250_p6 = scmp.lt.s32.totalorder %s43_s15, %s43_s15 }
  0x2c   :  { %p1246_p5 = scmp.ne.s32.totalorder %s43_s15, %s1245_s24  ;;  %p1251_p7 = scmp.lt.s32.totalorder %s1245_s24, %s1245_s24 }
  0x2e   :  { %p1252_p8 = por %p1251_p7, %p1250_p6 }
  0x30   :  { %p1253_p9 = pnand %p1252_p8, %p1246_p5 }
  0x32   :  { %1256 = shalt.err (!%p1253_p9)
}
  0x33   :  { %s1314_s0 = smov 128   ;;  %s1315_s18 = smov 8  }
  0x34   :  { %48 = dma.hbm_to_vmem [thread:$0]  %s1613_s2, 512, %s43_s15, [#allocation6], %s1314_s0, %s1314_s0, %s1315_s18  }
  0x35   :  { %s1316_s27 = smov [#allocation8]   ;;  %s1257_s5 = scalar_lea.hbm %s1614_s3, 384 }
  0x36   :  { %s54_s28 = sshll.u32 %s1316_s27, 4  ;;  %p1258_p10 = scmp.ne.s32.totalorder %s1614_s3, %s1257_s5  ;;  %s55_s28 = int_to_ptr.vmem [resolvable:$true] %s54_s28 }
  0x37   :  { %p1261_p11 = scmp.lt.u32.totalorder %s1257_s5, %s1614_s3 }
  0x39   :  { %p1263_p12 = pnand %p1261_p11, %p1258_p10 }
  0x3b   :  { %1266 = shalt.err (!%p1263_p12)
}
  0x3c   :  { %s1267_s10 = scalar_lea.vmem %s55_s28, 384  ;;  %p1272_p0 = scmp.lt.s32.totalorder %s55_s28, %s55_s28 }
  0x3d   :  { %p1268_p13 = scmp.ne.s32.totalorder %s55_s28, %s1267_s10  ;;  %p1273_p1 = scmp.lt.s32.totalorder %s1267_s10, %s1267_s10 }
  0x3f   :  { %p1274_p2 = por %p1273_p1, %p1272_p0 }
  0x41   :  { %p1275_p3 = pnand %p1274_p2, %p1268_p13 }
  0x43   :  { %1278 = shalt.err (!%p1275_p3)
}
  0x44   :  { %s1317_s2 = smov 64   ;;  %s1318_s11 = smov 4  }
  0x45   :  { %60 = dma.hbm_to_vmem [thread:$0]  %s1614_s3, 384, %s55_s28, [#allocation9], %s1317_s2, %s1317_s2, %s1318_s11  }
  0x46   :  { %1301 = dma.done.wait [#allocation3], 96  }
  0x47   :  { %1302 = vsyncadd [#allocation3], 4294967200 }
  0x48   :  { %1303 = dma.done.wait [#allocation6], 608  }
  0x49   :  { %1304 = vsyncadd [#allocation6], 4294966688 }
  0x4a   :  { %1305 = dma.done.wait [#allocation9], 384  }
  0x4b   :  { %1306 = vsyncadd [#allocation9], 4294966912  ;;  %v1319_v0 = vmov 0.0|0.0   ;;  %vm1320_vm0 = vmmov 0   ;;  %v1321_v1 = vmov 0.0   ;;  %vm217_vm1 = vcmask 257024  }
  0x4c   :  { %1124 = vmatprep.subr.bf16.mxu0 %v1319_v0  ;;  %1066 = vmatprep.mubr.msk.f32.mxu0 %vm1320_vm0, %v1321_v1  ;;  %v73_v2 = vld [vmem:[#allocation8] sm:$0xf]  ;;  %v75_v3 = vld [vmem:[#allocation8 + $0x8] sm:$0xf]  ;;  %v1010_v4 = vld [vmem:[#allocation2] ss:$0 sm:$0xff] }
  0x4d   :  { %1130 = vmatprep.subr.bf16.mxu1 %v1319_v0  ;;  %1077 = vmatprep.mubr.msk.f32.mxu1 %vm1320_vm0, %v1321_v1  ;;  %v1012_v5 = vld [vmem:[#allocation2 + $0x2] ss:$0 sm:$0xff]  ;;  %v121_v6 = vmul.f32 %v1010_v4, %v73_v2  ;;  %v76_v7 = vld [vmem:[#allocation8 + $0xc] sm:$0xf]  ;;  %v1013_v8 = vld [vmem:[#allocation2 + $0x3] ss:$0 sm:$0xff] }
  0x4e   :  { %v1418_v9 = vmul.f32 %v1012_v5, %v75_v3  ;;  %v1420_v10 = vmul.f32 %v1013_v8, %v76_v7  ;;  %v74_v11 = vld [vmem:[#allocation8 + $0x4] sm:$0xf]  ;;  %v1011_v12 = vld [vmem:[#allocation2 + $0x1] ss:$0 sm:$0xff]  ;;  %v1015_v16 = vld [vmem:[#allocation2 + $0x5] ss:$0 sm:$0xff] }
  0x4f   :  { %v78_v13 = vld [vmem:[#allocation8 + $0x14] sm:$0xf]  ;;  %v211_v14 = vmul.f32 %v121_v6, %v121_v6  ;;  %v122_v15 = vmul.f32 %v1011_v12, %v74_v11  ;;  %v77_v17 = vld [vmem:[#allocation8 + $0x10] sm:$0xf]  ;;  %v1014_v18 = vld [vmem:[#allocation2 + $0x4] ss:$0 sm:$0xff] }
  0x50   :  { %v213_v19 = vmul.f32 %v1418_v9, %v121_v6  ;;  %v214_v20 = vmul.f32 %v1420_v10, %v121_v6  ;;  %v1424_v21 = vmul.f32 %v1015_v16, %v78_v13  ;;  %v1426_v22 = vmul.f32 %v1014_v18, %v77_v17  ;;  %v127_v26 = vld [vmem:[#allocation7] sm:$0xff]  ;;  %v128_v27 = vld [vmem:[#allocation7 + $0x8] sm:$0xff]  ;;  %v129_v32 = vld [vmem:[#allocation7 + $0x10] sm:$0xff]  ;;  %s1328_s3 = smov [#allocation10]  }
  0x51   :  { %v218_v23 = vsel %vm217_vm1, %v211_v14, 0.0  ;;  %v212_v24 = vmul.f32 %v122_v15, %v121_v6  ;;  %v130_v33 = vld [vmem:[#allocation7 + $0x18] sm:$0xff]  ;;  %v1125_v34 = vpack.c.bf16 %v128_v27, %v127_v26  ;;  %v394_v36 = vmul.f32 %v1418_v9, %v122_v15  ;;  %s996_s13 = sshll.u32 %s1328_s3, 4  ;;  %s997_s13 = int_to_ptr.vmem [resolvable:$true] %s996_s13 }
  0x52   :  { %v224_v25 = vsel %vm217_vm1, %v213_v19, 0.0  ;;  %219 = vadd.xlane.f32.xlu0 %v218_v23  ;;  %v215_v29 = vmul.f32 %v1426_v22, %v121_v6  ;;  %v227_v30 = vsel %vm217_vm1, %v214_v20, 0.0  ;;  %v216_v31 = vmul.f32 %v1424_v21, %v121_v6  ;;  %v1017_v51 = vld [vmem:[#allocation5] ss:$0 sm:$0xff]  ;;  %v1476_v56 = vld [vmem:[#allocation5 + $0x1] ss:$0 sm:$0xff]  ;;  %p1284_p5 = scmp.lt.s32.totalorder %s997_s13, %s997_s13 }
  0x53   :  { %225 = vadd.xlane.f32.xlu1 %v224_v25  ;;  %v221_v28 = vsel %vm217_vm1, %v212_v24, 0.0  ;;  %1126 = vmatpush3.bf16.msra.mxu0 %v1125_v34  ;;  %v1128_v37 = vpack.c.bf16 %v130_v33, %v129_v32  ;;  %v393_v39 = vmul.f32 %v122_v15, %v122_v15  ;;  %v401_v40 = vsel %vm217_vm1, %v394_v36, 0.0  ;;  %v1478_v57 = vld [vmem:[#allocation5 + $0x2] ss:$0 sm:$0xff]  ;;  %v1496_v14 = vld [vmem:[#allocation5 + $0x5] ss:$0 sm:$0xff] }
  0x54   :  { %v230_v35 = vsel %vm217_vm1, %v215_v29, 0.0  ;;  %v233_v38 = vsel %vm217_vm1, %v216_v31, 0.0  ;;  %1127 = vmatprep.subr.bf16.mxu0 %v1319_v0  ;;  %1132 = vmatpush3.bf16.msra.mxu1 %v1125_v34  ;;  %v397_v41 = vmul.f32 %v1424_v21, %v122_v15  ;;  %vm137_vm2 = vcmask 261120   ;;  %s1279_s14 = scalar_lea.vmem %s997_s13, 384 }
  0x55   :  { %1133 = vmatprep.subr.bf16.mxu1 %v1319_v0  ;;  %v398_v42 = vsel %vm217_vm1, %v393_v39, 0.0  ;;  %v395_v43 = vmul.f32 %v1420_v10, %v122_v15  ;;  %v396_v46 = vmul.f32 %v1426_v22, %v122_v15  ;;  %v1322_v47 = vmov 0   ;;  %p1280_p4 = scmp.ne.s32.totalorder %s997_s13, %s1279_s14  ;;  %p1285_p6 = scmp.lt.s32.totalorder %s1279_s14, %s1279_s14 }
  0x56   :  { %222 = vadd.xlane.f32.xlu0 %v221_v28  ;;  %v410_v44 = vsel %vm217_vm1, %v397_v41, 0.0  ;;  %1181 = vset.pattern.permute.xlu1 %v1322_v47  ;;  %v534_v49 = vmul.f32 %v1418_v9, %v1418_v9  ;;  %v1323_v63 = vmov 1   ;;  %v1324_v18 = vmov 2  }
  0x57   :  { %228 = vadd.xlane.f32.xlu1 %v227_v30  ;;  %1129 = vmatpush3.bf16.msra.mxu0 %v1128_v37  ;;  %v404_v45 = vsel %vm217_vm1, %v395_v43, 0.0  ;;  %v407_v48 = vsel %vm217_vm1, %v396_v46, 0.0  ;;  %v535_v29 = vmul.f32 %v1420_v10, %v1418_v9  ;;  %v536_v31 = vmul.f32 %v1426_v22, %v1418_v9  ;;  %p1286_p7 = por %p1285_p6, %p1284_p5 }
  0x58   :  { %1135 = vmatpush3.bf16.msra.mxu1 %v1128_v37  ;;  %1136 = vmatprep.subr.bf16.mxu0 %v1319_v0  ;;  %v538_v50 = vsel %vm217_vm1, %v534_v49, 0.0  ;;  %v1325_v32 = vmov 3   ;;  %v933_v49 = vmul.f32 %v1424_v21, %v1424_v21 }
  0x59   :  { %1142 = vmatprep.subr.bf16.mxu1 %v1319_v0  ;;  %1180 = vset.pattern.permute.xlu0 %v1322_v47  ;;  %v541_v30 = vsel %vm217_vm1, %v535_v29, 0.0  ;;  %v544_v33 = vsel %vm217_vm1, %v536_v31, 0.0  ;;  %v805_v47 = vmul.f32 %v1424_v21, %v1426_v22  ;;  %p1287_p8 = pnand %p1286_p7, %p1280_p4 }
  0x5a   :  { %231 = vadd.xlane.f32.xlu0 %v230_v35  ;;  %1067 = vmatmul.mubr.msk.f32.vlgmr.msra.gmra.mrb[0].mxu0 %vm137_vm2, %v121_v6  ;;  %v1491_v6 = vld [vmem:[#allocation5 + $0x4] ss:$0 sm:$0xff] }
  0x5b   :  { %234 = vadd.xlane.f32.xlu1 %v233_v38  ;;  %1078 = vmatmul.mubr.msk.f32.vlgmr.msra.gmra.mrb[0].mxu1 %vm137_vm2, %v122_v15 }
  0x5c   :  { %1138 = vmatpush3.bf16.msra.mxu0 %v1125_v34  ;;  %1088 = vmatprep.mubr.msk.f32.mxu0 %vm1320_vm0, %v1321_v1 }
  0x5d   :  { %1139 = vmatprep.subr.bf16.mxu0 %v1319_v0  ;;  %1144 = vmatpush3.bf16.msra.mxu1 %v1125_v34 }
  0x5e   :  { %402 = vadd.xlane.f32.xlu0 %v401_v40  ;;  %1145 = vmatprep.subr.bf16.mxu1 %v1319_v0 }
  0x5f   :  { %399 = vadd.xlane.f32.xlu1 %v398_v42  ;;  %1099 = vmatprep.mubr.msk.f32.mxu1 %vm1320_vm0, %v1321_v1  ;;  %v672_v42 = vmul.f32 %v1426_v22, %v1420_v10 }
  0x60   :  { %1141 = vmatpush3.bf16.msra.mxu0 %v1128_v37 }
  0x61   :  { %1147 = vmatpush3.bf16.msra.mxu1 %v1128_v37  ;;  %1148 = vmatprep.subr.bf16.mxu0 %v1319_v0  ;;  %v677_v43 = vsel %vm217_vm1, %v672_v42, 0.0 }
  0x62   :  { %411 = vadd.xlane.f32.xlu0 %v410_v44  ;;  %1154 = vmatprep.subr.bf16.mxu1 %v1319_v0  ;;  %v804_v44 = vmul.f32 %v1426_v22, %v1426_v22 }
  0x63   :  { %405 = vadd.xlane.f32.xlu1 %v404_v45  ;;  %1089 = vmatmul.mubr.msk.f32.vlgmr.msra.gmra.mrb[2].mxu0 %vm137_vm2, %v1418_v9 }
  0x64   :  { %1100 = vmatmul.mubr.msk.f32.vlgmr.msra.gmra.mrb[2].mxu1 %vm137_vm2, %v1420_v10  ;;  %1150 = vmatpush3.bf16.msra.mxu0 %v1125_v34  ;;  %v806_v46 = vsel %vm217_vm1, %v804_v44, 0.0 }
  0x65   :  { %1156 = vmatpush3.bf16.msra.mxu1 %v1125_v34  ;;  %1121 = vmatprep.mubr.msk.f32.mxu1 %vm1320_vm0, %v1321_v1  ;;  %v537_v34 = vmul.f32 %v1424_v21, %v1418_v9 }
  0x66   :  { %1157 = vmatprep.subr.bf16.mxu1 %v1319_v0  ;;  %1151 = vmatprep.subr.bf16.mxu0 %v1319_v0  ;;  %v1484_v0 = vld [vmem:[#allocation5 + $0x3] ss:$0 sm:$0xff] }
  0x67   :  { %408 = vadd.xlane.f32.xlu1 %v407_v48  ;;  %1110 = vmatprep.mubr.msk.f32.mxu0 %vm1320_vm0, %v1321_v1  ;;  %v547_v35 = vsel %vm217_vm1, %v537_v34, 0.0  ;;  %v809_v48 = vsel %vm217_vm1, %v805_v47, 0.0 }
  0x68   :  { %1153 = vmatpush3.bf16.msra.mxu0 %v1128_v37 }
  0x69   :  { %1159 = vmatpush3.bf16.msra.mxu1 %v1128_v37 }
  0x6b   :  { %539 = vadd.xlane.f32.xlu1 %v538_v50  ;;  %1111 = vmatmul.mubr.msk.f32.vlgmr.msra.gmra.mrb[4].mxu0 %vm137_vm2, %v1426_v22  ;;  %v934_v50 = vsel %vm217_vm1, %v933_v49, 0.0 }
  0x6c   :  { %1122 = vmatmul.mubr.msk.f32.vlgmr.msra.gmra.mrb[4].mxu1 %vm137_vm2, %v1424_v21 }
  0xdf   :  { %v220_v52 = vpop.xlane.xlu0 %219 }
  0xe0   :  { %v226_v53 = vpop.xlane.xlu1 %225  ;;  %v272_v54 = vmul.f32 %v1017_v51, %v220_v52 }
  0xe1   :  { %v550_v55 = vmul.f32 %v1017_v51, %v226_v53  ;;  %v274_v62 = vmul.f32 %v1478_v57, %v226_v53 }
  0xe2   :  { %280 = vperm.xlu0 %1180, %v272_v54  }
  0xe3   :  { %v223_v58 = vpop.xlane.xlu0 %222 }
  0xe4   :  { %v229_v59 = vpop.xlane.xlu1 %228  ;;  %v273_v60 = vmul.f32 %v1476_v56, %v223_v58  ;;  %v413_v23 = vmul.f32 %v1017_v51, %v223_v58 }
  0xe5   :  { %v1481_v61 = vmul.f32 %v1017_v51, %v229_v59  ;;  %v275_v5 = vmul.f32 %v1484_v0, %v229_v59 }
  0xe6   :  { %285 = vperm.xlu1 %1181, %v273_v60   ;;  %1183 = vset.pattern.permute.xlu0 %v1323_v63 }
  0xe7   :  { %v232_v1 = vpop.xlane.xlu0 %231 }
  0xe8   :  { %v235_v2 = vpop.xlane.xlu1 %234  ;;  %v1486_v3 = vmul.f32 %v1017_v51, %v232_v1  ;;  %v276_v13 = vmul.f32 %v1491_v6, %v232_v1 }
  0xe9   :  { %v1488_v4 = vmul.f32 %v1017_v51, %v235_v2  ;;  %v277_v17 = vmul.f32 %v1496_v14, %v235_v2 }
  0xea   :  { %290 = vperm.xlu1 %1181, %v274_v62   ;;  %v1326_v62 = vmov 5  }
  0xeb   :  { %v403_v7 = vpop.xlane.xlu0 %402 }
  0xec   :  { %v400_v8 = vpop.xlane.xlu1 %399  ;;  %v551_v11 = vmul.f32 %v1476_v56, %v403_v7  ;;  %v415_v24 = vmul.f32 %v1478_v57, %v403_v7 }
  0xed   :  { %v414_v12 = vmul.f32 %v1476_v56, %v400_v8 }
  0xee   :  { %295 = vperm.xlu1 %1181, %v275_v5  }
  0xef   :  { %426 = vperm.xlu0 %1183, %v414_v12   ;;  %v412_v27 = vpop.xlane.xlu0 %411 }
  0xf0   :  { %v406_v15 = vpop.xlane.xlu1 %405  ;;  %v418_v28 = vmul.f32 %v1496_v14, %v412_v27  ;;  %v938_v59 = vmul.f32 %v1476_v56, %v412_v27 }
  0xf1   :  { %v684_v16 = vmul.f32 %v1476_v56, %v406_v15  ;;  %v416_v25 = vmul.f32 %v1484_v0, %v406_v15 }
  0xf2   :  { %300 = vperm.xlu1 %1181, %v276_v13  }
  0xf3   :  { %1184 = vset.pattern.permute.xlu0 %v1324_v18 }
  0xf4   :  { %v409_v19 = vpop.xlane.xlu1 %408 }
  0xf5   :  { %v1501_v20 = vmul.f32 %v1476_v56, %v409_v19  ;;  %v417_v26 = vmul.f32 %v1491_v6, %v409_v19 }
  0xf6   :  { %305 = vperm.xlu1 %1181, %v277_v17  }
  0xf8   :  { %v540_v9 = vpop.xlane.xlu1 %539 }
  0xf9   :  { %v552_v45 = vmul.f32 %v1478_v57, %v540_v9 }
  0xfa   :  { %1182 = vset.pattern.permute.xlu1 %v1323_v63 }
  0xfb   :  { %421 = vperm.xlu1 %1182, %v413_v23  }
  0xff   :  { %431 = vperm.xlu1 %1182, %v415_v24  }
 0x103   :  { %436 = vperm.xlu1 %1182, %v416_v25  }
 0x107   :  { %441 = vperm.xlu1 %1182, %v417_v26  }
 0x10b   :  { %446 = vperm.xlu1 %1182, %v418_v28  }
 0x10e   :  { %542 = vadd.xlane.f32.xlu0 %v541_v30 }
 0x10f   :  { %1185 = vset.pattern.permute.xlu1 %v1324_v18 }
 0x124   :  { %558 = vperm.xlu0 %1184, %v550_v55  }
 0x128   :  { %1187 = vset.pattern.permute.xlu0 %v1325_v32 }
 0x12d   :  { %v207_v36 = vpop.f32.mrb[0].mxu0 }
 0x12e   :  { %v389_v37 = vpop.f32.mrb[0].mxu1  ;;  %v1068_v38 = vpop.f32.mrb[1].mxu0 }
 0x12f   :  { %545 = vadd.xlane.f32.xlu1 %v544_v33  ;;  %v1079_v39 = vpop.f32.mrb[1].mxu1 }
 0x133   :  { %548 = vadd.xlane.f32.xlu1 %v547_v35 }
 0x136   :  { %v1517_v40 = vpop.f32.mrb[2].mxu0 }
 0x137   :  { %v1090_v41 = vpop.f32.mrb[3].mxu0  ;;  %v1532_v51 = vpop.f32.mrb[2].mxu1 }
 0x138   :  { %v1101_v52 = vpop.f32.mrb[3].mxu1 }
 0x13f   :  { %v1534_v22 = vpop.f32.mrb[4].mxu1 }
 0x140   :  { %v1123_v60 = vpop.f32.mrb[5].mxu1 }
 0x143   :  { %678 = vadd.xlane.f32.xlu0 %v677_v43 }
 0x144   :  { %563 = vperm.xlu1 %1185, %v551_v11  }
 0x147   :  { %807 = vadd.xlane.f32.xlu0 %v806_v46 }
 0x148   :  { %568 = vperm.xlu1 %1185, %v552_v45  }
 0x14b   :  { %810 = vadd.xlane.f32.xlu0 %v809_v48 }
 0x14f   :  { %935 = vadd.xlane.f32.xlu0 %v934_v50 }
 0x161   :  { %v281_v53 = vpop.permute.xlu0 %280 }
 0x162   :  { %v308_v54 = vmul.f32 %v281_v53, %v207_v36 }
 0x165   :  { %696 = vperm.xlu0 %1187, %v684_v16   ;;  %v286_v55 = vpop.permute.xlu1 %285 }
 0x166   :  { %v309_v58 = vmul.f32 %v286_v55, %v207_v36 }
 0x169   :  { %1190 = vset.pattern.permute.xlu0 %v1326_v62  ;;  %v291_v63 = vpop.permute.xlu1 %290 }
 0x16a   :  { %v310_v1 = vmul.f32 %v291_v63, %v207_v36  ;;  %950 = vperm.xlu0 %1190, %v938_v59  }
 0x16d   :  { %v296_v2 = vpop.permute.xlu1 %295 }
 0x16e   :  { %v311_v5 = vmul.f32 %v296_v2, %v207_v36  ;;  %v427_v7 = vpop.permute.xlu0 %426 }
 0x16f   :  { %v450_v8 = vmul.f32 %v427_v7, %v389_v37 }
 0x171   :  { %v456_v11 = vadd.f32 %v450_v8, %v309_v58  ;;  %v301_v12 = vpop.permute.xlu1 %300  ;;  %v671_v58 = vmul.f32 %v1420_v10, %v1420_v10 }
 0x172   :  { %v312_v13 = vmul.f32 %v301_v12, %v207_v36 }
 0x173   :  { %v674_v60 = vsel %vm217_vm1, %v671_v58, 0.0 }
 0x175   :  { %v306_v15 = vpop.permute.xlu1 %305 }
 0x176   :  { %v313_v16 = vmul.f32 %v306_v15, %v207_v36 }
 0x17a   :  { %v422_v17 = vpop.permute.xlu1 %421 }
 0x17b   :  { %v449_v18 = vmul.f32 %v422_v17, %v389_v37 }
 0x17d   :  { %v455_v19 = vadd.f32 %v449_v18, %v308_v54 }
 0x17e   :  { %v432_v56 = vpop.permute.xlu1 %431 }
 0x17f   :  { %v451_v23 = vmul.f32 %v432_v56, %v389_v37 }
 0x181   :  { %v457_v24 = vadd.f32 %v451_v23, %v310_v1 }
 0x182   :  { %v437_v25 = vpop.permute.xlu1 %436 }
 0x183   :  { %v452_v26 = vmul.f32 %v437_v25, %v389_v37 }
 0x185   :  { %v458_v27 = vadd.f32 %v452_v26, %v311_v5 }
 0x186   :  { %v442_v28 = vpop.permute.xlu1 %441 }
 0x187   :  { %v453_v29 = vmul.f32 %v442_v28, %v389_v37  ;;  %v1327_v28 = vmov 4  }
 0x189   :  { %v459_v30 = vadd.f32 %v453_v29, %v312_v13  ;;  %v800_v29 = vpop.f32.mrb[4].mxu0 }
 0x18a   :  { %v447_v31 = vpop.permute.xlu1 %446 }
 0x18b   :  { %v454_v33 = vmul.f32 %v447_v31, %v389_v37 }
 0x18d   :  { %v460_v34 = vadd.f32 %v454_v33, %v313_v16 }
 0x19b   :  { %v543_v35 = vpop.xlane.xlu0 %542 }
 0x19c   :  { %v553_v38 = vmul.f32 %v1484_v0, %v543_v35  ;;  %v685_v5 = vmul.f32 %v1478_v57, %v543_v35 }
 0x19e   :  { %573 = vperm.xlu1 %1185, %v553_v38  }
 0x1a3   :  { %v559_v36 = vpop.permute.xlu0 %558 }
 0x1a4   :  { %v586_v39 = vmul.f32 %v559_v36, %v1517_v40 }
 0x1a6   :  { %v592_v41 = vadd.f32 %v586_v39, %v455_v19 }
 0x1bc   :  { %v546_v42 = vpop.xlane.xlu1 %545 }
 0x1bd   :  { %v554_v43 = vmul.f32 %v1491_v6, %v546_v42  ;;  %v814_v31 = vmul.f32 %v1478_v57, %v546_v42 }
 0x1bf   :  { %578 = vperm.xlu1 %1185, %v554_v43  }
 0x1c0   :  { %v1541_v44 = vpop.xlane.xlu1 %548 }
 0x1c1   :  { %v555_v9 = vmul.f32 %v1496_v14, %v1541_v44 }
 0x1c3   :  { %583 = vperm.xlu1 %1185, %v555_v9  }
 0x1c4   :  { %v564_v37 = vpop.permute.xlu1 %563 }
 0x1c5   :  { %v587_v45 = vmul.f32 %v564_v37, %v1517_v40 }
 0x1c7   :  { %v593_v46 = vadd.f32 %v587_v45, %v456_v11  ;;  %1186 = vset.pattern.permute.xlu1 %v1325_v32  ;;  %v673_v32 = vmul.f32 %v1424_v21, %v1420_v10 }
 0x1c8   :  { %v569_v47 = vpop.permute.xlu1 %568 }
 0x1c9   :  { %v588_v48 = vmul.f32 %v569_v47, %v1517_v40  ;;  %v680_v2 = vsel %vm217_vm1, %v673_v32, 0.0 }
 0x1cb   :  { %v594_v49 = vadd.f32 %v588_v48, %v457_v24 }
 0x1d0   :  { %v679_v50 = vpop.xlane.xlu0 %678 }
 0x1d1   :  { %v815_v33 = vmul.f32 %v1484_v0, %v679_v50 }
 0x1d4   :  { %v808_v52 = vpop.xlane.xlu0 %807 }
 0x1d8   :  { %v811_v53 = vpop.xlane.xlu0 %810 }
 0x1d9   :  { %v941_v54 = vmul.f32 %v1491_v6, %v811_v53  ;;  %v817_v35 = vmul.f32 %v1496_v14, %v811_v53 }
 0x1db   :  { %965 = vperm.xlu0 %1190, %v941_v54  }
 0x1dc   :  { %v936_v55 = vpop.xlane.xlu0 %935 }
 0x1dd   :  { %v942_v38 = vmul.f32 %v1496_v14, %v936_v55 }
 0x1e4   :  { %v697_v59 = vpop.permute.xlu0 %696 }
 0x1e5   :  { %v720_v63 = vmul.f32 %v697_v59, %v1532_v51 }
 0x1e7   :  { %v1555_v1 = vadd.f32 %v720_v63, %v593_v46  ;;  %675 = vadd.xlane.f32.xlu1 %v674_v60 }
 0x1eb   :  { %681 = vadd.xlane.f32.xlu1 %v680_v2 }
 0x1fc   :  { %691 = vperm.xlu1 %1186, %v1481_v61   ;;  %v687_v61 = vmul.f32 %v1491_v6, %v679_v50 }
 0x200   :  { %701 = vperm.xlu1 %1186, %v685_v5  }
 0x21d   :  { %v574_v7 = vpop.permute.xlu1 %573 }
 0x21e   :  { %v589_v8 = vmul.f32 %v574_v7, %v1517_v40 }
 0x220   :  { %v595_v11 = vadd.f32 %v589_v8, %v458_v27 }
 0x23e   :  { %v579_v12 = vpop.permute.xlu1 %578 }
 0x23f   :  { %v590_v10 = vmul.f32 %v579_v12, %v1517_v40 }
 0x241   :  { %v596_v21 = vadd.f32 %v590_v10, %v459_v30  ;;  %v1112_v30 = vpop.f32.mrb[5].mxu0 }
 0x242   :  { %v584_v13 = vpop.permute.xlu1 %583 }
 0x243   :  { %v591_v15 = vmul.f32 %v584_v13, %v1517_v40 }
 0x245   :  { %v597_v16 = vadd.f32 %v591_v15, %v460_v34  ;;  %v816_v34 = vmul.f32 %v1491_v6, %v808_v52 }
 0x274   :  { %v676_v17 = vpop.xlane.xlu1 %675 }
 0x275   :  { %v686_v18 = vmul.f32 %v1484_v0, %v676_v17 }
 0x277   :  { %706 = vperm.xlu1 %1186, %v686_v18  }
 0x278   :  { %v682_v19 = vpop.xlane.xlu1 %681 }
 0x279   :  { %v688_v56 = vmul.f32 %v1496_v14, %v682_v19 }
 0x27b   :  { %711 = vperm.xlu1 %1186, %v687_v61  }
 0x27c   :  { %v692_v23 = vpop.permute.xlu1 %691 }
 0x27d   :  { %v719_v24 = vmul.f32 %v692_v23, %v1532_v51 }
 0x27f   :  { %v725_v25 = vadd.f32 %v719_v24, %v592_v41  ;;  %716 = vperm.xlu1 %1186, %v688_v56  }
 0x280   :  { %v702_v26 = vpop.permute.xlu1 %701 }
 0x281   :  { %v721_v27 = vmul.f32 %v702_v26, %v1532_v51 }
 0x283   :  { %v727_v40 = vadd.f32 %v721_v27, %v594_v49  ;;  %1188 = vset.pattern.permute.xlu1 %v1327_v28 }
 0x284   :  { %820 = vperm.xlu1 %1188, %v1486_v3   ;;  %v939_v3 = vmul.f32 %v1478_v57, %v1541_v44 }
 0x288   :  { %825 = vperm.xlu1 %1188, %v1501_v20   ;;  %v940_v20 = vmul.f32 %v1484_v0, %v682_v19  ;;  %v951_v0 = vpop.permute.xlu0 %950 }
 0x289   :  { %v974_v46 = vmul.f32 %v951_v0, %v1534_v22 }
 0x28c   :  { %830 = vperm.xlu1 %1188, %v814_v31  }
 0x290   :  { %835 = vperm.xlu1 %1188, %v815_v33  }
 0x294   :  { %840 = vperm.xlu1 %1188, %v816_v34  }
 0x298   :  { %845 = vperm.xlu1 %1188, %v817_v35  }
 0x29c   :  { %1189 = vset.pattern.permute.xlu1 %v1326_v62 }
 0x29d   :  { %945 = vperm.xlu1 %1189, %v1488_v4  }
 0x2a1   :  { %955 = vperm.xlu1 %1189, %v939_v3  }
 0x2a5   :  { %960 = vperm.xlu1 %1189, %v940_v20  }
 0x2a9   :  { %970 = vperm.xlu1 %1189, %v942_v38  }
 0x2f6   :  { %v707_v6 = vpop.permute.xlu1 %706 }
 0x2f7   :  { %v722_v36 = vmul.f32 %v707_v6, %v1532_v51 }
 0x2f9   :  { %v728_v39 = vadd.f32 %v722_v36, %v595_v11 }
 0x2fa   :  { %v712_v41 = vpop.permute.xlu1 %711 }
 0x2fb   :  { %v723_v42 = vmul.f32 %v712_v41, %v1532_v51 }
 0x2fd   :  { %v729_v62 = vadd.f32 %v723_v42, %v596_v21 }
 0x2fe   :  { %v717_v43 = vpop.permute.xlu1 %716 }
 0x2ff   :  { %v724_v4 = vmul.f32 %v717_v43, %v1532_v51  ;;  %v966_v51 = vpop.permute.xlu0 %965 }
 0x300   :  { %v977_v60 = vmul.f32 %v966_v51, %v1534_v22 }
 0x301   :  { %v730_v9 = vadd.f32 %v724_v4, %v597_v16 }
 0x303   :  { %v821_v57 = vpop.permute.xlu1 %820 }
 0x304   :  { %v848_v44 = vmul.f32 %v821_v57, %v800_v29 }
 0x306   :  { %v854_v37 = vadd.f32 %v848_v44, %v725_v25 }
 0x307   :  { %v826_v45 = vpop.permute.xlu1 %825 }
 0x308   :  { %v849_v14 = vmul.f32 %v826_v45, %v800_v29 }
 0x30a   :  { %v855_v47 = vadd.f32 %v849_v14, %v1555_v1 }
 0x30b   :  { %v831_v48 = vpop.permute.xlu1 %830 }
 0x30c   :  { %v980_v49 = vadd.f32 %v974_v46, %v855_v47  ;;  %v850_v50 = vmul.f32 %v831_v48, %v800_v29 }
 0x30e   :  { %986 = vst.msk [vmem:[#allocation10 + $0x4] sm:$0xf] %vm217_vm1, %v980_v49  ;;  %v856_v52 = vadd.f32 %v850_v50, %v727_v40 }
 0x30f   :  { %v836_v53 = vpop.permute.xlu1 %835 }
 0x310   :  { %v851_v54 = vmul.f32 %v836_v53, %v800_v29 }
 0x312   :  { %v857_v55 = vadd.f32 %v851_v54, %v728_v39 }
 0x313   :  { %v841_v58 = vpop.permute.xlu1 %840 }
 0x314   :  { %v852_v59 = vmul.f32 %v841_v58, %v800_v29 }
 0x316   :  { %v858_v32 = vadd.f32 %v852_v59, %v729_v62 }
 0x317   :  { %v846_v63 = vpop.permute.xlu1 %845 }
 0x318   :  { %v983_v2 = vadd.f32 %v977_v60, %v858_v32  ;;  %v853_v5 = vmul.f32 %v846_v63, %v800_v29 }
 0x31a   :  { %989 = vst.msk [vmem:[#allocation10 + $0x10] sm:$0xf] %vm217_vm1, %v983_v2  ;;  %v859_v1 = vadd.f32 %v853_v5, %v730_v9 }
 0x31c   :  { %v946_v7 = vpop.permute.xlu1 %945 }
 0x31d   :  { %v973_v8 = vmul.f32 %v946_v7, %v1534_v22 }
 0x31f   :  { %v979_v11 = vadd.f32 %v973_v8, %v854_v37 }
 0x320   :  { %v956_v12 = vpop.permute.xlu1 %955 }
 0x321   :  { %985 = vst.msk [vmem:[#allocation10] sm:$0xf] %vm217_vm1, %v979_v11  ;;  %v975_v10 = vmul.f32 %v956_v12, %v1534_v22 }
 0x323   :  { %v981_v21 = vadd.f32 %v975_v10, %v856_v52 }
 0x324   :  { %v961_v13 = vpop.permute.xlu1 %960 }
 0x325   :  { %987 = vst.msk [vmem:[#allocation10 + $0x8] sm:$0xf] %vm217_vm1, %v981_v21  ;;  %v976_v15 = vmul.f32 %v961_v13, %v1534_v22 }
 0x327   :  { %v982_v16 = vadd.f32 %v976_v15, %v857_v55 }
 0x328   :  { %v971_v17 = vpop.permute.xlu1 %970 }
 0x329   :  { %988 = vst.msk [vmem:[#allocation10 + $0xc] sm:$0xf] %vm217_vm1, %v982_v16  ;;  %v978_v18 = vmul.f32 %v971_v17, %v1534_v22 }
 0x32b   :  { %v984_v61 = vadd.f32 %v978_v18, %v859_v1 }
 0x32d   :  { %990 = vst.msk [vmem:[#allocation10 + $0x14] sm:$0xf] %vm217_vm1, %v984_v61 }
 0x32e   :  { %1290 = shalt.err (!%p1287_p8)
}
 0x32f   :  { %s1291_s17 = scalar_lea.hbm %s1615_s4, 384 }
 0x330   :  { %p1292_p9 = scmp.ne.s32.totalorder %s1615_s4, %s1291_s17  ;;  %p1295_p10 = scmp.lt.u32.totalorder %s1291_s17, %s1615_s4 }
 0x332   :  { %p1297_p11 = pnand %p1295_p10, %p1292_p9 }
 0x334   :  { %1300 = shalt.err (!%p1297_p11)
}
 0x335   :  { %1002 = dma.vmem_to_hbm [thread:$0]  %s997_s13, 384, %s1615_s4, [#allocation4], %s1317_s2, %s1317_s2, %s1318_s11  }
 0x336   :  { %1307 = dma.done.wait [#allocation4], 384  }
 0x337   :  { %1308 = vsyncadd [#allocation4], 4294966912 }
 0x338   :  { %1006 = vsyncpa [#allocation3], 1 }
 0x339   :  { %1007 = vsyncpa [#allocation6], 1 }
 0x33a   :  { %1008 = vsyncpa [#allocation9], 1 }
 0x33b   :  { %1009 = vsyncpa [#allocation4], 1 }

</bundles_post_ra>
